<compile_context>
chip_gen: v6e
topology: v6e:2x2x1
jax: 0.10.0
libtpu: 0.0.40
codegen_flags: <defaults>
</compile_context>

<pallas_src>
import functools

import jax
import jax.numpy as jnp
from jax.experimental import pallas as pl
from jax.experimental.pallas import tpu as pltpu


_VMEM_LIMIT = 40 * 1024 * 1024   # above default scoped limits, comfortably < v7x 64 MiB
_SIM_BUDGET = 8 * 1024 * 1024    # cap on the (tq, HW) f32 similarity block


# ---------------------------------------------------------------------------
# weight preparation
# ---------------------------------------------------------------------------
def _fold_bn(w, gamma, beta, mean, var, eps=1e-5):
    """Fold eval-mode BatchNorm into a bias-free 1x1 conv weight (Cout, Cin).

    Returns (W, b) in matmul form: y = x @ W + b with W: (Cin, Cout), b: (1, Cout).
    """
    scale = gamma / jnp.sqrt(var + eps)
    w_f = w * scale[:, None]
    b_f = beta - mean * scale
    return w_f.T.astype(jnp.float32), b_f[None, :].astype(jnp.float32)


def make_params(key, C, Ct):
    keys = jax.random.split(key, 6)

    def conv_bn(k, cin, cout):
        k1, k2, k3, k4, k5 = jax.random.split(k, 5)
        w = jax.random.normal(k1, (cout, cin), jnp.float32) / jnp.sqrt(cin)
        gamma = 1.0 + 0.1 * jax.random.normal(k2, (cout,), jnp.float32)
        beta = 0.1 * jax.random.normal(k3, (cout,), jnp.float32)
        mean = 0.1 * jax.random.normal(k4, (cout,), jnp.float32)
        var = jnp.abs(jax.random.normal(k5, (cout,), jnp.float32)) + 0.5
        return _fold_bn(w, gamma, beta, mean, var)

    p = {}
    p['wq1'], p['bq1'] = conv_bn(keys[0], C, Ct)        # query_project conv1
    p['wq2'], p['bq2'] = conv_bn(keys[1], Ct, Ct)       # query_project conv2
    p['wk1'], p['bk1'] = conv_bn(keys[2], 2 * C, Ct)    # key_project conv1
    p['wk2'], p['bk2'] = conv_bn(keys[3], Ct, Ct)       # key_project conv2
    p['wv'], p['bv'] = conv_bn(keys[4], 2 * C, Ct)      # value_project
    p['wo'], p['bo'] = conv_bn(keys[5], Ct, C)          # out_project
    return p


# ---------------------------------------------------------------------------
# kernels
# ---------------------------------------------------------------------------
def _proj_kernel(x_ref, gk_ref, gv_ref,
                 wq1_ref, bq1_ref, wq2_ref, bq2_ref,
                 wk1_ref, wk2_ref, bk2_ref,
                 wv_ref,
                 q_ref, k_ref, v_ref, *, q_scale):
    """Fused 1x1-conv(+folded BN)+ReLU projections on (C, ts) tiles -> Q/K/V (Ct, ts)."""
    x = x_ref[0]                                    # (C, ts)  bf16

    def mm(w_ref, a):
        # (Cin, Cout) x (Cin, ts) contracting Cin -> (Cout, ts), f32 accumulation
        return jax.lax.dot_general(w_ref[...], a, (((0,), (0,)), ((), ())),
                                   preferred_element_type=jnp.float32)

    # query_project; Ct^-0.5 matmul_norm scale applied in f32 before the bf16 store
    q1 = jnp.maximum(mm(wq1_ref, x) + bq1_ref[...], 0.0).astype(jnp.bfloat16)
    q = jnp.maximum(mm(wq2_ref, q1) + bq2_ref[...], 0.0) * q_scale
    q_ref[0] = q.astype(jnp.bfloat16)

    # key_project: global half of conv1 is rank-1 -> per-batch bias gk (Ct, 1)
    k1 = jnp.maximum(mm(wk1_ref, x) + gk_ref[0], 0.0).astype(jnp.bfloat16)
    k = jnp.maximum(mm(wk2_ref, k1) + bk2_ref[...], 0.0)
    k_ref[0] = k.astype(jnp.bfloat16)

    # value_project: global half likewise folded into gv (Ct, 1)
    v = jnp.maximum(mm(wv_ref, x) + gv_ref[0], 0.0)
    v_ref[0] = v.astype(jnp.bfloat16)


def _attn_kernel(q_ref, k_ref, v_ref, wo_ref, bo_ref, o_ref):
    """Single-pass softmax attention (full K/V resident) + fused out_project.

    q: (Ct, tq), k/v: (Ct, HW), output: (C, tq) written lane-dense in NCHW order.
    """
    q = q_ref[0]                                    # (Ct, tq) bf16
    k = k_ref[0]                                    # (Ct, HW) bf16

    # sim[i, j] = <q[:, i], k[:, j]> -> (tq, HW), f32
    sim = jax.lax.dot_general(q, k, (((0,), (0,)), ((), ())),
                              preferred_element_type=jnp.float32)
    m = jnp.max(sim, axis=-1, keepdims=True)
    p = jnp.exp(sim - m)
    l = jnp.sum(p, axis=-1, keepdims=True)
    p = (p * (1.0 / l)).astype(jnp.bfloat16)        # exact softmax normalization

    # ctx^T = V P^T -> (Ct, tq)
    ctx = jax.lax.dot_general(v_ref[0], p, (((1,), (1,)), ((), ())),
                              preferred_element_type=jnp.float32)

    # out_project + ReLU: (Ct, C) x (Ct, tq) contracting Ct -> (C, tq)
    out = jax.lax.dot_general(wo_ref[...], ctx.astype(jnp.bfloat16),
                              (((0,), (0,)), ((), ())),
                              preferred_element_type=jnp.float32)
    o_ref[0] = jnp.maximum(out + bo_ref[...], 0.0).astype(o_ref.dtype)


# ---------------------------------------------------------------------------
# wrapper
# ---------------------------------------------------------------------------
def _pick_tile(total, target):
    """Largest divisor of `total` that is <= target, preferring multiples of 128."""
    t = min(target, total)
    for cand in range(t - t % 128, 0, -128):
        if total % cand == 0:
            return cand
    while total % t:
        t -= 1
    return t


def image_level_context(x_nchw, params, *, proj_tile=512, q_tile=512):
    """ImageLevelContext forward (concat_input=False), eval-mode BN folded."""
    N, C, H, W = x_nchw.shape
    HW = H * W
    Ct = params['wq2'].shape[1]
    out_dtype = x_nchw.dtype
    f32, bf16 = jnp.float32, jnp.bfloat16

    # ---- tile selection -------------------------------------------------------
    ts = _pick_tile(HW, proj_tile)
    tq = _pick_tile(HW, min(q_tile, max(128, _SIM_BUDGET // (4 * HW))))
    if N * (HW // tq) < 2 and HW > 128:             # keep 2 TCs busy on v7x
        tq = _pick_tile(HW, max(1, tq // 2))

    # ---- weight prep: bf16 matmul weights (Cin, Cout), f32 biases as (Cout, 1) ----
    q8 = lambda w: w.astype(bf16)
    col = lambda b: b.reshape(-1, 1).astype(f32)
    wq1, bq1 = q8(params['wq1']), col(params['bq1'])
    wq2, bq2 = q8(params['wq2']), col(params['bq2'])
    wk1x = q8(params['wk1'][C:])
    wk2, bk2 = q8(params['wk2']), col(params['bk2'])
    wvx = q8(params['wv'][C:])
    wo, bo = q8(params['wo']), col(params['bo'])

    # NCHW -> (N, C, HW): reshape only (no transpose); bf16 operands for the MXU.
    x_seq = x_nchw.reshape(N, C, HW).astype(bf16)

    # Global average pool (bilinear upsample of a 1x1 map is a constant broadcast) and
    # the rank-1 "global" halves of key/value conv1 collapse to per-batch bias vectors.
    x_mean = jnp.mean(x_seq, axis=2, dtype=f32)                              # (N, C)
    gk = (x_mean @ params['wk1'][:C].astype(bf16).astype(f32)
          + params['bk1'])[..., None].astype(f32)                           # (N, Ct, 1)
    gv = (x_mean @ params['wv'][:C].astype(bf16).astype(f32)
          + params['bv'])[..., None].astype(f32)                            # (N, Ct, 1)

    def cparams(sem):
        return pltpu.CompilerParams(dimension_semantics=sem,
                                    vmem_limit_bytes=_VMEM_LIMIT)

    def wspec(shape):
        return pl.BlockSpec(shape, lambda b, s: (0, 0))

    # ---- 1) fused projections -> Q, K, V as (N, Ct, HW) bf16 -----------------------
    q_seq, k_seq, v_seq = pl.pallas_call(
        functools.partial(_proj_kernel, q_scale=float(Ct) ** -0.5),
        out_shape=tuple(jax.ShapeDtypeStruct((N, Ct, HW), bf16) for _ in range(3)),
        grid=(N, HW // ts),
        in_specs=[
            pl.BlockSpec((1, C, ts), lambda b, s: (b, 0, s)),    # x tile
            pl.BlockSpec((1, Ct, 1), lambda b, s: (b, 0, 0)),    # gk
            pl.BlockSpec((1, Ct, 1), lambda b, s: (b, 0, 0)),    # gv
            wspec((C, Ct)), wspec((Ct, 1)),                      # wq1, bq1
            wspec((Ct, Ct)), wspec((Ct, 1)),                     # wq2, bq2
            wspec((C, Ct)),                                      # wk1 (local half)
            wspec((Ct, Ct)), wspec((Ct, 1)),                     # wk2, bk2
            wspec((C, Ct)),                                      # wv  (local half)
        ],
        out_specs=tuple(pl.BlockSpec((1, Ct, ts), lambda b, s: (b, 0, s))
                        for _ in range(3)),
        compiler_params=cparams(("parallel", "parallel")),
    )(x_seq, gk, gv, wq1, bq1, wq2, bq2, wk1x, wk2, bk2, wvx)

    # ---- 2) single-pass softmax attention + fused out_project ----------------------
    # Full per-batch K/V stay resident in VMEM (no re-streaming per q-tile); the output
    # is produced directly in (N, C, HW) order with lane-dense stores and in out_dtype.
    out_seq = pl.pallas_call(
        _attn_kernel,
        out_shape=jax.ShapeDtypeStruct((N, C, HW), out_dtype),
        grid=(N, HW // tq),
        in_specs=[
            pl.BlockSpec((1, Ct, tq), lambda b, qi: (b, 0, qi)),   # Q tile
            pl.BlockSpec((1, Ct, HW), lambda b, qi: (b, 0, 0)),    # full K
            pl.BlockSpec((1, Ct, HW), lambda b, qi: (b, 0, 0)),    # full V
            pl.BlockSpec((Ct, C), lambda b, qi: (0, 0)),           # wo
            pl.BlockSpec((C, 1), lambda b, qi: (0, 0)),            # bo
        ],
        out_specs=pl.BlockSpec((1, C, tq), lambda b, qi: (b, 0, qi)),
        compiler_params=cparams(("parallel", "parallel")),
    )(q_seq, k_seq, v_seq, wo, bo)

    # (N, C, HW) -> NCHW is a free reshape.
    return out_seq.reshape(N, C, H, W)


# ---------------------------------------------------------------------------
# pure-JAX reference (same bf16 quantization of x / weights as the kernel)
# ---------------------------------------------------------------------------
def reference(x_nchw, params):
    f32, bf16 = jnp.float32, jnp.bfloat16
    x_nchw = x_nchw.astype(bf16).astype(f32)
    q8 = lambda w: w.astype(bf16).astype(f32)

    N, C, H, W = x_nchw.shape
    x = x_nchw.reshape(N, C, H * W).transpose(0, 2, 1)
    xg = jnp.mean(x, axis=1, keepdims=True)
    kf = jnp.concatenate([jnp.broadcast_to(xg, x.shape), x], axis=-1)

    def proj(a, w, b):
        return jax.nn.relu(jnp.einsum('nsc,cd->nsd', a, q8(w)) + b)

    q = proj(proj(x, params['wq1'], params['bq1']), params['wq2'], params['bq2'])
    k = proj(proj(kf, params['wk1'], params['bk1']), params['wk2'], params['bk2'])
    v = proj(kf, params['wv'], params['bv'])
    ct = params['wq2'].shape[1]
    sim = jnp.einsum('nqc,nkc->nqk', q, k) * (float(ct) ** -0.5)
    p = jax.nn.softmax(sim, axis=-1)
    ctx = jnp.einsum('nqk,nkc->nqc', p, v)
    out = proj(ctx, params['wo'], params['bo'])
    return out.transpose(0, 2, 1).reshape(N, C, H, W)


if __name__ == "__main__":
    key = jax.random.PRNGKey(0)
    kx, kp = jax.random.split(key)

    # feats_channels=32, transform_channels=16, 16x16 spatial -> HW=256 (lane aligned).
    N, C, H, W = 2, 32, 16, 16
    Ct = 16

    x = jax.random.normal(kx, (N, C, H, W), jnp.float32)
    params = make_params(kp, C, Ct)

    out = jax.block_until_ready(image_level_context(x, params))
    assert out.shape == (N, C, H, W), out.shape

    ref = reference(x, params)
    if not jnp.allclose(out, ref, atol=5e-2, rtol=5e-2):
        err = jnp.max(jnp.abs(out - ref))
        raise AssertionError(
            f"Pallas kernel output does not match JAX reference (max|diff|={err})")

    print("KERNEL_OK")
</pallas_src>

<mosaic_0001>
module attributes {stable_mosaic.version = 11 : i64} {
  func.func @_proj_kernel(%arg0: i32, %arg1: i32, %arg2: memref<1x32x256xbf16, #tpu.memory_space<vmem>>, %arg3: memref<1x16x1xf32, #tpu.memory_space<vmem>>, %arg4: memref<1x16x1xf32, #tpu.memory_space<vmem>>, %arg5: memref<32x16xbf16, #tpu.memory_space<vmem>>, %arg6: memref<16x1xf32, #tpu.memory_space<vmem>>, %arg7: memref<16x16xbf16, #tpu.memory_space<vmem>>, %arg8: memref<16x1xf32, #tpu.memory_space<vmem>>, %arg9: memref<32x16xbf16, #tpu.memory_space<vmem>>, %arg10: memref<16x16xbf16, #tpu.memory_space<vmem>>, %arg11: memref<16x1xf32, #tpu.memory_space<vmem>>, %arg12: memref<32x16xbf16, #tpu.memory_space<vmem>>, %arg13: memref<1x16x256xbf16, #tpu.memory_space<vmem>>, %arg14: memref<1x16x256xbf16, #tpu.memory_space<vmem>>, %arg15: memref<1x16x256xbf16, #tpu.memory_space<vmem>>) attributes {dimension_semantics = [#tpu.dimension_semantics<parallel>, #tpu.dimension_semantics<parallel>], iteration_bounds = array<i64: 2, 1>, scalar_prefetch = 0 : i64, scratch_operands = 0 : i64, tpu.core_type = #tpu.core_type<tc>, window_params = [{transform_indices = @transform_0, window_bounds = array<i64: 1, 32, 256>}, {transform_indices = @transform_1, window_bounds = array<i64: 1, 16, 1>}, {transform_indices = @transform_2, window_bounds = array<i64: 1, 16, 1>}, {pipeline_mode = #tpu.pipeline_mode<synchronous>, transform_indices = @transform_3, window_bounds = array<i64: 32, 16>}, {pipeline_mode = #tpu.pipeline_mode<synchronous>, transform_indices = @transform_4, window_bounds = array<i64: 16, 1>}, {pipeline_mode = #tpu.pipeline_mode<synchronous>, transform_indices = @transform_5, window_bounds = array<i64: 16, 16>}, {pipeline_mode = #tpu.pipeline_mode<synchronous>, transform_indices = @transform_6, window_bounds = array<i64: 16, 1>}, {pipeline_mode = #tpu.pipeline_mode<synchronous>, transform_indices = @transform_7, window_bounds = array<i64: 32, 16>}, {pipeline_mode = #tpu.pipeline_mode<synchronous>, transform_indices = @transform_8, window_bounds = array<i64: 16, 16>}, {pipeline_mode = #tpu.pipeline_mode<synchronous>, transform_indices = @transform_9, window_bounds = array<i64: 16, 1>}, {pipeline_mode = #tpu.pipeline_mode<synchronous>, transform_indices = @transform_10, window_bounds = array<i64: 32, 16>}, {transform_indices = @transform_11, window_bounds = array<i64: 1, 16, 256>}, {transform_indices = @transform_12, window_bounds = array<i64: 1, 16, 256>}, {transform_indices = @transform_13, window_bounds = array<i64: 1, 16, 256>}]} {
    %c0 = arith.constant 0 : index
    %c0_0 = arith.constant 0 : index
    %c0_1 = arith.constant 0 : index
    %0 = vector.load %arg2[%c0, %c0_0, %c0_1] : memref<1x32x256xbf16, #tpu.memory_space<vmem>>, vector<1x32x256xbf16>
    %1 = vector.shape_cast %0 : vector<1x32x256xbf16> to vector<32x256xbf16>
    %c0_2 = arith.constant 0 : index
    %c0_3 = arith.constant 0 : index
    %2 = vector.load %arg5[%c0_2, %c0_3] : memref<32x16xbf16, #tpu.memory_space<vmem>>, vector<32x16xbf16>
    %cst = arith.constant dense<0.000000e+00> : vector<16x256xf32>
    %3 = tpu.matmul %2, %1, %cst {dimension_numbers = #tpu.dot_dimension_numbers<[0], [0], [1], [1], [0, 1, 1, 1], [], []>} : vector<32x16xbf16>, vector<32x256xbf16>, vector<16x256xf32> -> vector<16x256xf32>
    %c0_4 = arith.constant 0 : index
    %c0_5 = arith.constant 0 : index
    %4 = vector.load %arg6[%c0_4, %c0_5] : memref<16x1xf32, #tpu.memory_space<vmem>>, vector<16x1xf32>
    %5 = vector.broadcast %4 : vector<16x1xf32> to vector<16x256xf32>
    %6 = arith.addf %3, %5 : vector<16x256xf32>
    %cst_6 = arith.constant 0.000000e+00 : f32
    %7 = vector.broadcast %cst_6 : f32 to vector<16x256xf32>
    %8 = arith.maximumf %6, %7 : vector<16x256xf32>
    %9 = arith.truncf %8 : vector<16x256xf32> to vector<16x256xbf16>
    %c0_7 = arith.constant 0 : index
    %c0_8 = arith.constant 0 : index
    %10 = vector.load %arg7[%c0_7, %c0_8] : memref<16x16xbf16, #tpu.memory_space<vmem>>, vector<16x16xbf16>
    %cst_9 = arith.constant dense<0.000000e+00> : vector<16x256xf32>
    %11 = tpu.matmul %10, %9, %cst_9 {dimension_numbers = #tpu.dot_dimension_numbers<[0], [0], [1], [1], [0, 1, 1, 1], [], []>} : vector<16x16xbf16>, vector<16x256xbf16>, vector<16x256xf32> -> vector<16x256xf32>
    %c0_10 = arith.constant 0 : index
    %c0_11 = arith.constant 0 : index
    %12 = vector.load %arg8[%c0_10, %c0_11] : memref<16x1xf32, #tpu.memory_space<vmem>>, vector<16x1xf32>
    %13 = vector.broadcast %12 : vector<16x1xf32> to vector<16x256xf32>
    %14 = arith.addf %11, %13 : vector<16x256xf32>
    %cst_12 = arith.constant 0.000000e+00 : f32
    %15 = vector.broadcast %cst_12 : f32 to vector<16x256xf32>
    %16 = arith.maximumf %14, %15 : vector<16x256xf32>
    %cst_13 = arith.constant 2.500000e-01 : f32
    %17 = vector.broadcast %cst_13 : f32 to vector<16x256xf32>
    %18 = arith.mulf %16, %17 : vector<16x256xf32>
    %19 = arith.truncf %18 : vector<16x256xf32> to vector<16x256xbf16>
    %c0_14 = arith.constant 0 : index
    %c0_15 = arith.constant 0 : index
    %c0_16 = arith.constant 0 : index
    %20 = vector.load %arg13[%c0_14, %c0_15, %c0_16] : memref<1x16x256xbf16, #tpu.memory_space<vmem>>, vector<1x16x256xbf16>
    %21 = vector.shape_cast %20 : vector<1x16x256xbf16> to vector<16x256xbf16>
    %22 = vector.shape_cast %19 : vector<16x256xbf16> to vector<1x16x256xbf16>
    tpu.vector_store %arg13[%c0_14, %c0_15, %c0_16], %22 {strides = array<i32>} : memref<1x16x256xbf16, #tpu.memory_space<vmem>>, vector<1x16x256xbf16>,
    %c0_17 = arith.constant 0 : index
    %c0_18 = arith.constant 0 : index
    %23 = vector.load %arg9[%c0_17, %c0_18] : memref<32x16xbf16, #tpu.memory_space<vmem>>, vector<32x16xbf16>
    %cst_19 = arith.constant dense<0.000000e+00> : vector<16x256xf32>
    %24 = tpu.matmul %23, %1, %cst_19 {dimension_numbers = #tpu.dot_dimension_numbers<[0], [0], [1], [1], [0, 1, 1, 1], [], []>} : vector<32x16xbf16>, vector<32x256xbf16>, vector<16x256xf32> -> vector<16x256xf32>
    %c0_20 = arith.constant 0 : index
    %c0_21 = arith.constant 0 : index
    %c0_22 = arith.constant 0 : index
    %25 = vector.load %arg3[%c0_20, %c0_21, %c0_22] : memref<1x16x1xf32, #tpu.memory_space<vmem>>, vector<1x16x1xf32>
    %26 = vector.shape_cast %25 : vector<1x16x1xf32> to vector<16x1xf32>
    %27 = vector.broadcast %26 : vector<16x1xf32> to vector<16x256xf32>
    %28 = arith.addf %24, %27 : vector<16x256xf32>
    %cst_23 = arith.constant 0.000000e+00 : f32
    %29 = vector.broadcast %cst_23 : f32 to vector<16x256xf32>
    %30 = arith.maximumf %28, %29 : vector<16x256xf32>
    %31 = arith.truncf %30 : vector<16x256xf32> to vector<16x256xbf16>
    %c0_24 = arith.constant 0 : index
    %c0_25 = arith.constant 0 : index
    %32 = vector.load %arg10[%c0_24, %c0_25] : memref<16x16xbf16, #tpu.memory_space<vmem>>, vector<16x16xbf16>
    %cst_26 = arith.constant dense<0.000000e+00> : vector<16x256xf32>
    %33 = tpu.matmul %32, %31, %cst_26 {dimension_numbers = #tpu.dot_dimension_numbers<[0], [0], [1], [1], [0, 1, 1, 1], [], []>} : vector<16x16xbf16>, vector<16x256xbf16>, vector<16x256xf32> -> vector<16x256xf32>
    %c0_27 = arith.constant 0 : index
    %c0_28 = arith.constant 0 : index
    %34 = vector.load %arg11[%c0_27, %c0_28] : memref<16x1xf32, #tpu.memory_space<vmem>>, vector<16x1xf32>
    %35 = vector.broadcast %34 : vector<16x1xf32> to vector<16x256xf32>
    %36 = arith.addf %33, %35 : vector<16x256xf32>
    %cst_29 = arith.constant 0.000000e+00 : f32
    %37 = vector.broadcast %cst_29 : f32 to vector<16x256xf32>
    %38 = arith.maximumf %36, %37 : vector<16x256xf32>
    %39 = arith.truncf %38 : vector<16x256xf32> to vector<16x256xbf16>
    %c0_30 = arith.constant 0 : index
    %c0_31 = arith.constant 0 : index
    %c0_32 = arith.constant 0 : index
    %40 = vector.load %arg14[%c0_30, %c0_31, %c0_32] : memref<1x16x256xbf16, #tpu.memory_space<vmem>>, vector<1x16x256xbf16>
    %41 = vector.shape_cast %40 : vector<1x16x256xbf16> to vector<16x256xbf16>
    %42 = vector.shape_cast %39 : vector<16x256xbf16> to vector<1x16x256xbf16>
    tpu.vector_store %arg14[%c0_30, %c0_31, %c0_32], %42 {strides = array<i32>} : memref<1x16x256xbf16, #tpu.memory_space<vmem>>, vector<1x16x256xbf16>,
    %c0_33 = arith.constant 0 : index
    %c0_34 = arith.constant 0 : index
    %43 = vector.load %arg12[%c0_33, %c0_34] : memref<32x16xbf16, #tpu.memory_space<vmem>>, vector<32x16xbf16>
    %cst_35 = arith.constant dense<0.000000e+00> : vector<16x256xf32>
    %44 = tpu.matmul %43, %1, %cst_35 {dimension_numbers = #tpu.dot_dimension_numbers<[0], [0], [1], [1], [0, 1, 1, 1], [], []>} : vector<32x16xbf16>, vector<32x256xbf16>, vector<16x256xf32> -> vector<16x256xf32>
    %c0_36 = arith.constant 0 : index
    %c0_37 = arith.constant 0 : index
    %c0_38 = arith.constant 0 : index
    %45 = vector.load %arg4[%c0_36, %c0_37, %c0_38] : memref<1x16x1xf32, #tpu.memory_space<vmem>>, vector<1x16x1xf32>
    %46 = vector.shape_cast %45 : vector<1x16x1xf32> to vector<16x1xf32>
    %47 = vector.broadcast %46 : vector<16x1xf32> to vector<16x256xf32>
    %48 = arith.addf %44, %47 : vector<16x256xf32>
    %cst_39 = arith.constant 0.000000e+00 : f32
    %49 = vector.broadcast %cst_39 : f32 to vector<16x256xf32>
    %50 = arith.maximumf %48, %49 : vector<16x256xf32>
    %51 = arith.truncf %50 : vector<16x256xf32> to vector<16x256xbf16>
    %c0_40 = arith.constant 0 : index
    %c0_41 = arith.constant 0 : index
    %c0_42 = arith.constant 0 : index
    %52 = vector.load %arg15[%c0_40, %c0_41, %c0_42] : memref<1x16x256xbf16, #tpu.memory_space<vmem>>, vector<1x16x256xbf16>
    %53 = vector.shape_cast %52 : vector<1x16x256xbf16> to vector<16x256xbf16>
    %54 = vector.shape_cast %51 : vector<16x256xbf16> to vector<1x16x256xbf16>
    tpu.vector_store %arg15[%c0_40, %c0_41, %c0_42], %54 {strides = array<i32>} : memref<1x16x256xbf16, #tpu.memory_space<vmem>>, vector<1x16x256xbf16>,
    return
  }
  func.func @transform_0(%arg0: i32, %arg1: i32) -> (i32, i32, i32) {
    %c0_i32 = arith.constant 0 : i32
    %c0_i32_0 = arith.constant 0 : i32
    return %arg0, %c0_i32, %arg1 : i32, i32, i32
  }
  func.func @transform_1(%arg0: i32, %arg1: i32) -> (i32, i32, i32) {
    %c0_i32 = arith.constant 0 : i32
    %c0_i32_0 = arith.constant 0 : i32
    %c0_i32_1 = arith.constant 0 : i32
    return %arg0, %c0_i32, %c0_i32_0 : i32, i32, i32
  }
  func.func @transform_2(%arg0: i32, %arg1: i32) -> (i32, i32, i32) {
    %c0_i32 = arith.constant 0 : i32
    %c0_i32_0 = arith.constant 0 : i32
    %c0_i32_1 = arith.constant 0 : i32
    return %arg0, %c0_i32, %c0_i32_0 : i32, i32, i32
  }
  func.func @transform_3(%arg0: i32, %arg1: i32) -> (i32, i32) {
    %c0_i32 = arith.constant 0 : i32
    %c0_i32_0 = arith.constant 0 : i32
    %c0_i32_1 = arith.constant 0 : i32
    return %c0_i32, %c0_i32_0 : i32, i32
  }
  func.func @transform_4(%arg0: i32, %arg1: i32) -> (i32, i32) {
    %c0_i32 = arith.constant 0 : i32
    %c0_i32_0 = arith.constant 0 : i32
    %c0_i32_1 = arith.constant 0 : i32
    return %c0_i32, %c0_i32_0 : i32, i32
  }
  func.func @transform_5(%arg0: i32, %arg1: i32) -> (i32, i32) {
    %c0_i32 = arith.constant 0 : i32
    %c0_i32_0 = arith.constant 0 : i32
    %c0_i32_1 = arith.constant 0 : i32
    return %c0_i32, %c0_i32_0 : i32, i32
  }
  func.func @transform_6(%arg0: i32, %arg1: i32) -> (i32, i32) {
    %c0_i32 = arith.constant 0 : i32
    %c0_i32_0 = arith.constant 0 : i32
    %c0_i32_1 = arith.constant 0 : i32
    return %c0_i32, %c0_i32_0 : i32, i32
  }
  func.func @transform_7(%arg0: i32, %arg1: i32) -> (i32, i32) {
    %c0_i32 = arith.constant 0 : i32
    %c0_i32_0 = arith.constant 0 : i32
    %c0_i32_1 = arith.constant 0 : i32
    return %c0_i32, %c0_i32_0 : i32, i32
  }
  func.func @transform_8(%arg0: i32, %arg1: i32) -> (i32, i32) {
    %c0_i32 = arith.constant 0 : i32
    %c0_i32_0 = arith.constant 0 : i32
    %c0_i32_1 = arith.constant 0 : i32
    return %c0_i32, %c0_i32_0 : i32, i32
  }
  func.func @transform_9(%arg0: i32, %arg1: i32) -> (i32, i32) {
    %c0_i32 = arith.constant 0 : i32
    %c0_i32_0 = arith.constant 0 : i32
    %c0_i32_1 = arith.constant 0 : i32
    return %c0_i32, %c0_i32_0 : i32, i32
  }
  func.func @transform_10(%arg0: i32, %arg1: i32) -> (i32, i32) {
    %c0_i32 = arith.constant 0 : i32
    %c0_i32_0 = arith.constant 0 : i32
    %c0_i32_1 = arith.constant 0 : i32
    return %c0_i32, %c0_i32_0 : i32, i32
  }
  func.func @transform_11(%arg0: i32, %arg1: i32) -> (i32, i32, i32) {
    %c0_i32 = arith.constant 0 : i32
    %c0_i32_0 = arith.constant 0 : i32
    return %arg0, %c0_i32, %arg1 : i32, i32, i32
  }
  func.func @transform_12(%arg0: i32, %arg1: i32) -> (i32, i32, i32) {
    %c0_i32 = arith.constant 0 : i32
    %c0_i32_0 = arith.constant 0 : i32
    return %arg0, %c0_i32, %arg1 : i32, i32, i32
  }
  func.func @transform_13(%arg0: i32, %arg1: i32) -> (i32, i32, i32) {
    %c0_i32 = arith.constant 0 : i32
    %c0_i32_0 = arith.constant 0 : i32
    return %arg0, %c0_i32, %arg1 : i32, i32, i32
  }
}

</mosaic_0001>

<bundles_post_ra>
// kernel: tpu_custom_call.1
= control target key start
LH: loop header
LB: loop body
LE: loop exit
PB: predicated region body
PF: predicated region fallthrough
CT: control target
= control target key end

     0   :  { %s1959_s0 = inlined_call_operand.vmem [shape: bf16[2,32,256], index: 0, kind: input, shape index: {}]   ;;  %s1960_s1 = inlined_call_operand.vmem [shape: f32[2,16,1], index: 1, kind: input, shape index: {}]   ;;  %s1961_s2 = inlined_call_operand.vmem [shape: f32[2,16,1], index: 2, kind: input, shape index: {}]   ;;  %s1962_s3 = inlined_call_operand.vmem [shape: bf16[32,16], index: 3, kind: input, shape index: {}]   ;;  %s1963_s4 = inlined_call_operand.vmem [shape: f32[16,1], index: 4, kind: input, shape index: {}]   ;;  %s1964_s5 = inlined_call_operand.vmem [shape: bf16[16,16], index: 5, kind: input, shape index: {}]   ;;  %s1965_s6 = inlined_call_operand.vmem [shape: f32[16,1], index: 6, kind: input, shape index: {}]   ;;  %s1966_s7 = inlined_call_operand.vmem [shape: bf16[32,16], index: 7, kind: input, shape index: {}]   ;;  %s1967_s8 = inlined_call_operand.vmem [shape: bf16[16,16], index: 8, kind: input, shape index: {}]   ;;  %s1968_s9 = inlined_call_operand.vmem [shape: f32[16,1], index: 9, kind: input, shape index: {}]   ;;  %s1969_s10 = inlined_call_operand.vmem [shape: bf16[32,16], index: 10, kind: input, shape index: {}]   ;;  %s1970_s11 = inlined_call_operand.hbm [shape: bf16[2,16,256], index: 11, kind: output, shape index: {0}]   ;;  %s1971_s12 = inlined_call_operand.hbm [shape: bf16[2,16,256], index: 12, kind: output, shape index: {1}]   ;;  %s1972_s13 = inlined_call_operand.hbm [shape: bf16[2,16,256], index: 13, kind: output, shape index: {2}]  }
   0x1   :  { %1980 = sst [smem:[#allocation10_spill]] %s1959_s0 }
   0x2   :  { %1981 = sst [smem:[#allocation11_spill]] %s1960_s1 }
   0x3   :  { %1982 = sst [smem:[#allocation12_spill]] %s1961_s2 }
   0x4   :  { %1983 = sst [smem:[#allocation13_spill]] %s1962_s3 }
   0x5   :  { %1984 = sst [smem:[#allocation14_spill]] %s1963_s4 }
   0x6   :  { %1985 = sst [smem:[#allocation15_spill]] %s1964_s5 }
   0x7   :  { %19 = vsyncpa [#allocation3], 0 }
   0x8   :  { %21 = vsyncpa [#allocation3 + $0x1], 0 }
   0x9   :  { %22 = vsyncpa [#allocation5], 0 }
   0xa   :  { %24 = vsyncpa [#allocation5 + $0x1], 0  ;;  %s1651_s25 = smov 0   ;;  %s1653_s26 = smov 0  }
   0xb   :  { %s1655_s27 = smov 0   ;;  %s1657_s28 = smov 0  }
   0xc   :  { %s1659_s29 = smov 0   ;;  %s1661_s30 = smov 0  }
   0xd LB: > { %s1974_s14 = sadd.s32 4294967295, %s1573_s30   ;;  %s1973_s15 = sadd.s32 4294967294, %s1573_s30   ;;  %s1573_s30 = sphi %s1661_s30, %s30_s30   ;;  %s1569_s29 = sphi %s1659_s29, %s2004_s29   ;;  %s1565_s28 = sphi %s1657_s28, %s2003_s28   ;;  %s1561_s27 = sphi %s1655_s27, %s2002_s27   ;;  %s1557_s26 = sphi %s1653_s26, %s2001_s26   ;;  %s1553_s25 = sphi %s1651_s25, %s2000_s25  }
   0xe   : > { %s42_s16 = sadd.s32 1, %s1569_s29  ;;  %s299_s17 = sadd.s32 1, %s1561_s27 }
   0xf   : > { %p44_p0 = scmp.ge.s32.totalorder %s42_s16, 2  ;;  %p309_p1 = scmp.ne.s32.totalorder %s1561_s27, %s1557_s26 }
  0x10   : > { %p310_p2 = scmp.eq.s32.totalorder %s1974_s14, 1  ;;  %p315_p3 = scmp.ne.s32.totalorder %s1557_s26, %s1553_s25 }
  0x11   : > { %s2006_s16 = smov (%p44_p0, %s42_s16), 0  ;;  %p316_p5 = scmp.eq.s32.totalorder %s1973_s15, 1 }
  0x12   : > { %1986 = sst [smem:[#allocation9_spill]] %s2006_s16  ;;  %p1693_p4 = por %p310_p2, %p309_p1 }
  0x13   : > { %s294_s19 = ssub.s32 %s1569_s29, %s2006_s16  ;;  %p1301_p6 = scmp.ge.s32.totalorder %s1573_s30, 1 }
  0x14   : > { %p297_p7 = scmp.eq.s32.totalorder %s294_s19, 0  ;;  %p1702_p8 = por %p316_p5, %p315_p3 }
  0x15   : > { %p443_p9 = scmp.lt.s32.totalorder %s1573_s30, 3 }
  0x16   : > { %s1708_s21 = scalar_select %p297_p7, %s1561_s27, %s299_s17  }
  0x17   : > { %p444_p10 = pnand %p1301_p6, %p443_p9 }
  0x18   : > { %s1989_s3 = sld [smem:[#allocation13_spill]] (!%p444_p10)  ;;  %p512_p11 = scmp.lt.s32.totalorder (!%p444_p10), %s1565_s28, 1 }
  0x19   : > { %447 = sbr.rel (%p444_p10) target bundleno = 796 (0x31c), region = 64  ;;  %s1990_s4 = sld [smem:[#allocation14_spill]] (!%p444_p10) }
  0x1a   : > { %s1991_s0 = sld [smem:[#allocation10_spill]] (!%p444_p10) }
  0x1b   : > { %s1992_s5 = sld [smem:[#allocation15_spill]] (!%p444_p10) }
  0x1c   : > { %s1993_s2 = sld [smem:[#allocation12_spill]] (!%p444_p10) }
  0x1d   : > { %s1994_s1 = sld [smem:[#allocation11_spill]] (!%p444_p10) }
  0x1e   : > { %v1427_v0 = vld [vmem:[%s1989_s3] sm:$0xff]   ;;  %v1428_v1 = vld [vmem:[%s1989_s3 + $0x8] sm:$0xff]   ;;  %s1718_s19 = scalar_select %p512_p11, %s1565_s28, 1  ;;  %v1575_v2 = vmov 0   ;;  %vm603_vm0 = vcmask 261120   ;;  %vm692_vm1 = vcmask 130048  }
  0x1f   : > { %567 = vxpose.xlu0.c.b16.start [1/2] (short) (narrow) %v1427_v0, 16  ;;  %639 = vmatprep.mubr.bf16.mxu0 %v1575_v2  ;;  %v543_v3 = vld [vmem:[%s1990_s4] sm:$0xff]  ;;  %v544_v4 = vld [vmem:[%s1990_s4 + $0x8] sm:$0xff] }
  0x20   : > { %1425 = vset.pattern.permute.xlu1 %v1575_v2  ;;  %728 = vmatprep.mubr.bf16.mxu1 %v1575_v2  ;;  %s1345_s22 = sshll.u32 %s1718_s19, 5  ;;  %v1435_v10 = vld [vmem:[%s1966_s7] sm:$0xff]   ;;  %v1436_v11 = vld [vmem:[%s1966_s7 + $0x8] sm:$0xff]  }
  0x21   : > { %547 = vperm.xlu1 %1425, %v543_v3   ;;  %s519_s15 = scalar_lea.vmem %s1991_s0, %s1345_s22  ;;  %v1439_v9 = vld [vmem:[%s1992_s5] sm:$0xff]   ;;  %v1438_v13 = vld [vmem:[%s1969_s10 + $0x8] sm:$0xff]   ;;  %s1346_s22 = sshll.u32 %s1718_s19, 4 }
  0x22   : > { %v1733_v5 = vld [vmem:[%s519_s15 + $0x14] ss:$8 sps:$4 sm:$0xff]   ;;  %v1735_v6 = vld [vmem:[%s519_s15 + $0x10] ss:$8 sps:$4 sm:$0xff]   ;;  %v1738_v7 = vld [vmem:[%s519_s15 + $0x4] ss:$8 sps:$4 sm:$0xff]   ;;  %s530_s14 = scalar_lea.vmem %s1993_s2, %s1346_s22 }
  0x23   : > { %568 = vxpose.xlu0.c.b16.end [2/2] (short) (narrow) %v1428_v1, 16  ;;  %619 = vmatprep.subr.bf16.mxu0 %v1733_v5  ;;  %v1741_v8 = vld [vmem:[%s519_s15] ss:$8 sps:$4 sm:$0xff]   ;;  %s525_s19 = scalar_lea.vmem %s1994_s1, %s1346_s22  ;;  %s494_s22 = sand.u32 1, %s1557_s26  }
  0x24   : > { %620 = vmatpush1.bf16.msra.mxu0 %v1735_v6  ;;  %v1437_v12 = vld [vmem:[%s1969_s10] sm:$0xff]   ;;  %v659_v14 = vld [vmem:[%s1965_s6 + $0x8] sm:$0xff]  ;;  %s1801_s23 = sshll.u32 %s494_s22, 4  ;;  %s1820_s0 = sshll.u32 %s1565_s28, 8 }
  0x25   : > { %552 = vperm.xlu1 %1425, %v544_v4   ;;  %621 = vmatprep.subr.bf16.mxu0 %v1738_v7  ;;  %v859_v15 = vld [vmem:[%s1968_s9] sm:$0xff]  ;;  %v860_v16 = vld [vmem:[%s1968_s9 + $0x8] sm:$0xff]  ;;  %s1806_s15 = scalar_lea.vmem [#allocation2], %s1801_s23  ;;  %s1813_s24 = scalar_lea.vmem [#allocation6], %s1801_s23 }
  0x26   : > { %v962_v17 = vld [vmem:[%s530_s14 + $0x8] sm:$0xff]  ;;  %v765_v19 = vld [vmem:[%s525_s19] sm:$0xff]  ;;  %s1828_s16 = scalar_lea.hbm %s1970_s11, %s1820_s0  ;;  %s1832_s5 = scalar_lea.sflag [#allocation3], %s494_s22 }
  0x27   : > { %676 = vxpose.xlu0.c.b16.start.end [1/1] (short) (narrow) %v1439_v9, 16  ;;  %v766_v20 = vld [vmem:[%s525_s19 + $0x8] sm:$0xff]  ;;  %v1440_v21 = vld [vmem:[%s1967_s8] sm:$0xff]   ;;  %s1576_s28 = smov [#allocation2]  }
  0x28   : > { %622 = vmatpush1.bf16.msra.mxu0 %v1741_v8  ;;  %v658_v22 = vld [vmem:[%s1965_s6] sm:$0xff]  ;;  %s1445_s17 = sshll.u32 %s1576_s28, 4  ;;  %s1446_s17 = int_to_ptr.vmem [resolvable:$false] %s1445_s17 }
  0x29   : > { %v961_v23 = vld [vmem:[%s530_s14] sm:$0xff]  ;;  %s1091_s14 = sshll.u32 %s1806_s15, 4  ;;  %s1822_s14 = int_to_ptr.vmem [resolvable:$true] %s1091_s14 }
  0x2a   : > { %s1441_s3 = scalar_lea.vmem %s1822_s14, 256  ;;  %p1448_p1 = scmp.lt.s32.totalorder %s1822_s14, %s1446_s17 }
  0x2b   : > { %p1442_p12 = scmp.ne.s32.totalorder %s1822_s14, %s1441_s3 }
  0x2d   : > { %p1443_p13 = pnand %p1442_p12, %p1693_p4 }
  0x2f   : > { %p1444_p0 = pneg %p1443_p13 }
  0x30   : > { %1426 = vset.pattern.permute.xlu0 %v1575_v2 }
  0x31   : > { %769 = vperm.xlu0 %1426, %v765_v19  }
  0x35   : > { %774 = vperm.xlu0 %1426, %v766_v20  }
  0x48   : > { %789 = vxpose.xlu1.c.b16.start [1/2] (short) (narrow) %v1435_v10, 16 }
  0x4c   : > { %790 = vxpose.xlu1.c.b16.end [2/2] (short) (narrow) %v1436_v11, 16 }
  0x50   : > { %985 = vxpose.xlu1.c.b16.start [1/2] (short) (narrow) %v1437_v12, 16 }
  0x53   : > { %877 = vxpose.xlu0.c.b16.start.end [1/1] (short) (narrow) %v1440_v21, 16 }
  0x54   : > { %986 = vxpose.xlu1.c.b16.end [2/2] (short) (narrow) %v1438_v13, 16 }
  0x58   : > { %667 = vperm.xlu1 %1425, %v659_v14  }
  0x5c   : > { %863 = vperm.xlu1 %1425, %v859_v15   ;;  %662 = vperm.xlu0 %1426, %v658_v22  }
  0x60   : > { %868 = vperm.xlu1 %1425, %v860_v16   ;;  %965 = vperm.xlu0 %1426, %v961_v23  }
  0x64   : > { %970 = vperm.xlu1 %1425, %v962_v17  }
  0x81   : > { %v575_v18 = vpop.trf.xlu0 }
  0x82   : > { %1317 = vmatmul.mubr.msk.bf16.vlgmr.msra.gmra.mxu0 %vm603_vm0, %v575_v18 }
  0x83   : > { %928 = vmatprep.mubr.bf16.mxu0 %v1575_v2 }
  0x89   : > { %v684_v40 = vpop.trf.xlu0 }
  0x9c   : > { %v548_v24 = vpop.permute.xlu1 %547 }
  0xa0   : > { %v553_v27 = vpop.permute.xlu1 %552 }
  0xaa   : > { %v797_v41 = vpop.trf.xlu1 }
  0xac   : > { %v770_v43 = vpop.permute.xlu0 %769 }
  0xb0   : > { %v775_v44 = vpop.permute.xlu0 %774 }
  0xb2   : > { %v993_v42 = vpop.trf.xlu1 }
  0xb5   : > { %v885_v45 = vpop.trf.xlu0 }
  0xd3   : > { %v668_v49 = vpop.permute.xlu1 %667 }
  0xd7   : > { %v663_v46 = vpop.permute.xlu0 %662  ;;  %v1803_v61 = vpop.permute.xlu1 %863 }
  0xdb   : > { %v966_v12 = vpop.permute.xlu0 %965 }
 0x142   : > { %v641_v25 = vpop.f32.mrf.mxu0 }
 0x143   : > { %v642_v31 = vadd.f32 %v641_v25, %v548_v24 }
 0x144   : > { %v643_v26 = vpop.f32.mrf.mxu0 }
 0x145   : > { %v644_v29 = vadd.f32 %v643_v26, %v548_v24  ;;  %v650_v37 = vmax.f32 %v642_v31, 0.0 }
 0x146   : > { %v645_v28 = vpop.f32.mrf.mxu0 }
 0x147   : > { %v646_v30 = vadd.f32 %v645_v28, %v553_v27  ;;  %v651_v35 = vmax.f32 %v644_v29, 0.0 }
 0x148   : > { %v647_v32 = vpop.f32.mrf.mxu0 }
 0x149   : > { %v648_v33 = vadd.f32 %v647_v32, %v553_v27  ;;  %v652_v34 = vmax.f32 %v646_v30, 0.0 }
 0x14b   : > { %v653_v36 = vmax.f32 %v648_v33, 0.0  ;;  %v654_v39 = vpack.c.bf16 %v652_v34, %v650_v37 }
 0x14d   : > { %v655_v38 = vpack.c.bf16 %v653_v36, %v651_v35 }
 0x14f   : > { %710 = vmatprep.subr.bf16.mxu1 %v655_v38 }
 0x150   : > { %711 = vmatpush1.bf16.msra.mxu1 %v654_v39 }
 0x151   : > { %820 = vmatprep.subr.bf16.mxu1 %v1733_v5 }
 0x153   : > { %1319 = vmatmul.mubr.msk.bf16.vlgmr.msra.gmra.mxu1 %vm692_vm1, %v684_v40 }
 0x154   : > { %821 = vmatpush1.bf16.msra.mxu1 %v1735_v6  ;;  %840 = vmatprep.mubr.bf16.mxu1 %v1575_v2 }
 0x155   : > { %822 = vmatprep.subr.bf16.mxu1 %v1738_v7 }
 0x158   : > { %823 = vmatpush1.bf16.msra.mxu1 %v1741_v8 }
 0x159   : > { %1016 = vmatprep.subr.bf16.mxu1 %v1733_v5 }
 0x15b   : > { %1324 = vmatmul.mubr.msk.bf16.vlgmr.msra.gmra.mxu1 %vm603_vm0, %v797_v41 }
 0x15c   : > { %1017 = vmatpush1.bf16.msra.mxu1 %v1735_v6  ;;  %1036 = vmatprep.mubr.bf16.mxu1 %v1575_v2 }
 0x15d   : > { %1018 = vmatprep.subr.bf16.mxu1 %v1738_v7 }
 0x160   : > { %1019 = vmatpush1.bf16.msra.mxu1 %v1741_v8  ;;  %v1809_v8 = vpop.permute.xlu1 %868 }
 0x163   : > { %1331 = vmatmul.mubr.msk.bf16.vlgmr.msra.gmra.mxu1 %vm603_vm0, %v993_v42 }
 0x164   : > { %v971_v22 = vpop.permute.xlu1 %970 }
 0x213   : > { %v730_v47 = vpop.f32.mrf.mxu1 }
 0x214   : > { %v731_v48 = vadd.f32 %v730_v47, %v663_v46 }
 0x215   : > { %v732_v50 = vpop.f32.mrf.mxu1 }
 0x216   : > { %v739_v51 = vmax.f32 %v731_v48, 0.0  ;;  %v733_v52 = vadd.f32 %v732_v50, %v663_v46 }
 0x217   : > { %v734_v53 = vpop.f32.mrf.mxu1 }
 0x218   : > { %v740_v54 = vmax.f32 %v733_v52, 0.0  ;;  %v735_v55 = vadd.f32 %v734_v53, %v668_v49  ;;  %v743_v57 = vmul.f32 0.25, %v739_v51 }
 0x219   : > { %v736_v56 = vpop.f32.mrf.mxu1 }
 0x21a   : > { %v744_v58 = vmul.f32 0.25, %v740_v54  ;;  %v741_v59 = vmax.f32 %v735_v55, 0.0  ;;  %v737_v60 = vadd.f32 %v736_v56, %v668_v49 }
 0x21b   : > { %v842_v62 = vpop.f32.mrf.mxu1 }
 0x21c   : > { %v1348_v63 = vpack.c.bf16 %v744_v58, %v743_v57  ;;  %v742_v0 = vmax.f32 %v737_v60, 0.0  ;;  %v745_v2 = vmul.f32 0.25, %v741_v59  ;;  %v843_v9 = vadd.f32 %v842_v62, %v770_v43 }
 0x21d   : > { %v844_v1 = vpop.f32.mrf.mxu1 }
 0x21e   : > { %759 = vst [vmem:[%s1806_s15] sm:$0xff] %v1348_v63  ;;  %v746_v3 = vmul.f32 0.25, %v742_v0  ;;  %v845_v6 = vadd.f32 %v844_v1, %v770_v43  ;;  %v851_v18 = vmax.f32 %v843_v9, 0.0 }
 0x21f   : > { %v846_v4 = vpop.f32.mrf.mxu1 }
 0x220   : > { %v1349_v5 = vpack.c.bf16 %v746_v3, %v745_v2  ;;  %v847_v7 = vadd.f32 %v846_v4, %v775_v44  ;;  %v852_v15 = vmax.f32 %v845_v6, 0.0 }
 0x221   : > { %v848_v10 = vpop.f32.mrf.mxu1 }
 0x222   : > { %760 = vst [vmem:[%s1806_s15 + $0x8] sm:$0xff] %v1349_v5  ;;  %v849_v11 = vadd.f32 %v848_v10, %v775_v44  ;;  %v853_v13 = vmax.f32 %v847_v7, 0.0  ;;  %s1447_s15 = scalar_lea.vmem %s1446_s17, 512 }
 0x223   : > { %v1038_v14 = vpop.f32.mrf.mxu1  ;;  %p1449_p2 = scmp.lt.s32.totalorder %s1447_s15, %s1441_s3 }
 0x224   : > { %v854_v16 = vmax.f32 %v849_v11, 0.0  ;;  %v1039_v17 = vadd.f32 %v1038_v14, %v966_v12  ;;  %v855_v23 = vpack.c.bf16 %v853_v13, %v851_v18 }
 0x225   : > { %v1040_v19 = vpop.f32.mrf.mxu1  ;;  %p1450_p3 = por %p1449_p2, %p1448_p1 }
 0x226   : > { %v856_v20 = vpack.c.bf16 %v854_v16, %v852_v15  ;;  %v1041_v21 = vadd.f32 %v1040_v19, %v966_v12  ;;  %v1047_v25 = vmax.f32 %v1039_v17, 0.0 }
 0x227   : > { %v1042_v24 = vpop.f32.mrf.mxu1  ;;  %p1451_p5 = pnand %p1450_p3, %p1444_p0 }
 0x228   : > { %v1048_v26 = vmax.f32 %v1041_v21, 0.0  ;;  %v1043_v27 = vadd.f32 %v1042_v24, %v971_v22  ;;  %910 = vmatprep.subr.bf16.mxu0 %v856_v20 }
 0x229   : > { %911 = vmatpush1.bf16.msra.mxu0 %v855_v23  ;;  %v1044_v28 = vpop.f32.mrf.mxu1 }
 0x22a   : > { %v1352_v29 = vpack.c.bf16 %v1048_v26, %v1047_v25  ;;  %v1045_v30 = vadd.f32 %v1044_v28, %v971_v22  ;;  %v1049_v31 = vmax.f32 %v1043_v27, 0.0 }
 0x22c   : > { %1063 = vst [vmem:[%s1813_s24] sm:$0xff] %v1352_v29  ;;  %v1050_v32 = vmax.f32 %v1045_v30, 0.0  ;;  %1326 = vmatmul.mubr.msk.bf16.vlgmr.msra.gmra.mxu0 %vm692_vm1, %v885_v45 }
 0x22e   : > { %v1353_v33 = vpack.c.bf16 %v1050_v32, %v1049_v31 }
 0x230   : > { %1064 = vst [vmem:[%s1813_s24 + $0x8] sm:$0xff] %v1353_v33 }
 0x231   : > { %1454 = shalt.err (!%p1451_p5)
}
 0x232   : > { %s1455_s22 = scalar_lea.hbm %s1828_s16, 256  ;;  %s1459_s28 = scalar_lea.hbm %s1970_s11, 512 }
 0x233   : > { %p1456_p6 = scmp.ne.s32.totalorder %s1828_s16, %s1455_s22  ;;  %p1460_p10 = scmp.lt.s32.totalorder %s1828_s16, %s1970_s11 }
 0x234   : > { %p1461_p11 = scmp.lt.s32.totalorder %s1459_s28, %s1455_s22 }
 0x235   : > { %p1457_p7 = pnand %p1456_p6, %p1693_p4 }
 0x236   : > { %p1462_p12 = por %p1461_p11, %p1460_p10 }
 0x237   : > { %p1458_p9 = pneg %p1457_p7 }
 0x239   : > { %p1463_p13 = pnand %p1462_p12, %p1458_p9 }
 0x23b   : > { %1466 = shalt.err (!%p1463_p13)
}
 0x23c   : > { %s1976_s3 = smov 128   ;;  %s1978_s17 = smov 8  }
 0x23d   : > { %1357 = dma.vmem_to_hbm [thread:$0]  (%p1693_p4), %s1822_s14, 256, %s1828_s16, %s1832_s5, %s1976_s3, %s1976_s3, %s1978_s17  }
 0x23e   : > { %s503_s1 = scalar_lea.vmem [#allocation4], %s1801_s23  ;;  %s1995_s14 = sadd.s32 4294967295, %s1573_s30  }
 0x23f   : > { %s1109_s2 = sshll.u32 %s503_s1, 4  ;;  %s1865_s16 = sand.u32 1, %s1995_s14   ;;  %s1868_s2 = int_to_ptr.vmem [resolvable:$true] %s1109_s2 }
 0x240   : > { %s1127_s5 = sshll.u32 %s1813_s24, 4  ;;  %s1874_s22 = scalar_lea.hbm %s1971_s12, %s1820_s0  ;;  %s1876_s5 = int_to_ptr.vmem [resolvable:$true] %s1127_s5 }
 0x241   : > { %s1882_s24 = scalar_lea.hbm %s1972_s13, %s1820_s0  ;;  %s1071_s28 = scalar_lea.sflag [#allocation5], %s1865_s16 }
 0x242   : > { %s1467_s14 = scalar_lea.vmem %s1868_s2, 256  ;;  %s1579_s3 = smov [#allocation4]  }
 0x243   : > { %p1468_p0 = scmp.ne.s32.totalorder %s1868_s2, %s1467_s14  ;;  %s1471_s17 = sshll.u32 %s1579_s3, 4  ;;  %s1472_s17 = int_to_ptr.vmem [resolvable:$false] %s1471_s17 }
 0x244   : > { %s1473_s15 = scalar_lea.vmem %s1472_s17, 512  ;;  %p1474_p3 = scmp.lt.s32.totalorder %s1868_s2, %s1472_s17 }
 0x245   : > { %p1469_p1 = pnand %p1468_p0, %p1693_p4  ;;  %p1475_p5 = scmp.lt.s32.totalorder %s1473_s15, %s1467_s14 }
 0x247   : > { %p1470_p2 = pneg %p1469_p1  ;;  %p1476_p6 = por %p1475_p5, %p1474_p3 }
 0x249   : > { %p1477_p7 = pnand %p1476_p6, %p1470_p2 }
 0x2ec   : > { %v930_v34 = vpop.f32.mrf.mxu0 }
 0x2ed   : > { %v931_v35 = vadd.f32 %v930_v34, %v1803_v61 }
 0x2ee   : > { %v932_v36 = vpop.f32.mrf.mxu0 }
 0x2ef   : > { %v933_v37 = vadd.f32 %v932_v36, %v1803_v61  ;;  %v939_v39 = vmax.f32 %v931_v35, 0.0 }
 0x2f0   : > { %v934_v38 = vpop.f32.mrf.mxu0 }
 0x2f1   : > { %v940_v40 = vmax.f32 %v933_v37, 0.0  ;;  %v935_v41 = vadd.f32 %v934_v38, %v1809_v8 }
 0x2f2   : > { %v936_v42 = vpop.f32.mrf.mxu0 }
 0x2f3   : > { %v1350_v43 = vpack.c.bf16 %v940_v40, %v939_v39  ;;  %v937_v44 = vadd.f32 %v936_v42, %v1809_v8  ;;  %v941_v45 = vmax.f32 %v935_v41, 0.0 }
 0x2f5   : > { %955 = vst [vmem:[%s503_s1] sm:$0xff] %v1350_v43  ;;  %v942_v46 = vmax.f32 %v937_v44, 0.0 }
 0x2f7   : > { %v1351_v47 = vpack.c.bf16 %v942_v46, %v941_v45 }
 0x2f9   : > { %956 = vst [vmem:[%s503_s1 + $0x8] sm:$0xff] %v1351_v47 }
 0x2fa   : > { %1480 = shalt.err (!%p1477_p7)
}
 0x2fb   : > { %s1481_s0 = scalar_lea.hbm %s1874_s22, 256  ;;  %s1485_s3 = scalar_lea.hbm %s1971_s12, 512 }
 0x2fc   : > { %p1482_p9 = scmp.ne.s32.totalorder %s1874_s22, %s1481_s0  ;;  %p1486_p12 = scmp.lt.s32.totalorder %s1874_s22, %s1971_s12 }
 0x2fd   : > { %p1487_p13 = scmp.lt.s32.totalorder %s1485_s3, %s1481_s0 }
 0x2fe   : > { %p1483_p10 = pnand %p1482_p9, %p1693_p4 }
 0x2ff   : > { %p1488_p0 = por %p1487_p13, %p1486_p12 }
 0x300   : > { %p1484_p11 = pneg %p1483_p10 }
 0x302   : > { %p1489_p1 = pnand %p1488_p0, %p1484_p11 }
 0x304   : > { %1492 = shalt.err (!%p1489_p1)
}
 0x305   : > { %s1996_s17 = smov 8   ;;  %s1997_s14 = smov 128  }
 0x306   : > { %1358 = dma.vmem_to_hbm [thread:$0]  (%p1693_p4), %s1868_s2, 256, %s1874_s22, %s1071_s28, %s1997_s14, %s1997_s14, %s1996_s17  }
 0x307   : > { %s1493_s15 = scalar_lea.vmem %s1876_s5, 256  ;;  %s1580_s0 = smov [#allocation6]  }
 0x308   : > { %p1494_p2 = scmp.ne.s32.totalorder %s1876_s5, %s1493_s15  ;;  %s1497_s1 = sshll.u32 %s1580_s0, 4  ;;  %s1498_s1 = int_to_ptr.vmem [resolvable:$false] %s1497_s1 }
 0x309   : > { %s1499_s23 = scalar_lea.vmem %s1498_s1, 512  ;;  %p1500_p6 = scmp.lt.s32.totalorder %s1876_s5, %s1498_s1 }
 0x30a   : > { %p1495_p3 = pnand %p1494_p2, %p1693_p4  ;;  %p1501_p7 = scmp.lt.s32.totalorder %s1499_s23, %s1493_s15 }
 0x30c   : > { %p1496_p5 = pneg %p1495_p3  ;;  %p1502_p9 = por %p1501_p7, %p1500_p6 }
 0x30e   : > { %p1503_p10 = pnand %p1502_p9, %p1496_p5 }
 0x310   : > { %1506 = shalt.err (!%p1503_p10)
}
 0x311   : > { %s1507_s3 = scalar_lea.hbm %s1882_s24, 256  ;;  %s1511_s4 = scalar_lea.hbm %s1972_s13, 512 }
 0x312   : > { %p1508_p11 = scmp.ne.s32.totalorder %s1882_s24, %s1507_s3  ;;  %p1512_p0 = scmp.lt.s32.totalorder %s1882_s24, %s1972_s13 }
 0x313   : > { %p1513_p1 = scmp.lt.s32.totalorder %s1511_s4, %s1507_s3 }
 0x314   : > { %p1509_p12 = pnand %p1508_p11, %p1693_p4 }
 0x315   : > { %p1514_p2 = por %p1513_p1, %p1512_p0 }
 0x316   : > { %p1510_p13 = pneg %p1509_p12 }
 0x318   : > { %p1515_p3 = pnand %p1514_p2, %p1510_p13 }
 0x31a   : > { %1518 = shalt.err (!%p1515_p3)
}
 0x31b   : > { %1359 = dma.vmem_to_hbm [thread:$0]  (%p1693_p4), %s1876_s5, 256, %s1882_s24, %s1071_s28, %s1997_s14, %s1997_s14, %s1996_s17  }
 0x31c PF: > { %p1373_p5 = scmp.ge.s32.totalorder %s1573_s30, 2  ;;  %s1142_s15 = sand.u32 1, %s1553_s25  }
 0x31d   : > { %s1143_s1 = scalar_lea.sflag [#allocation3], %s1142_s15 }
 0x31e   : > { %p1364_p6 = pnand %p1373_p5, %p1702_p8 }
 0x320   : > { %p1365_p7 = pneg %p1364_p6 }
 0x322   : > { %1544 = dma.done.wait (%p1365_p7), %s1143_s1, 256  }
 0x323   : > { %1546 = vsyncadd (%p1365_p7), %s1143_s1, 4294967040  ;;  %s1998_s18 = sadd.s32 4294967294, %s1573_s30  }
 0x324   : > { %s1151_s23 = sand.u32 1, %s1998_s18  }
 0x325   : > { %s1152_s3 = scalar_lea.sflag [#allocation5], %s1151_s23 }
 0x326   : > { %1548 = dma.done.wait (%p1365_p7), %s1152_s3, 512  }
 0x327   : > { %1550 = vsyncadd (%p1365_p7), %s1152_s3, 4294966784  ;;  %s30_s30 = sadd.s32 1, %s1573_s30   ;;  %s1999_s16 = sld [smem:[#allocation9_spill]] }
 0x328   : > { %p27_p4 = scmp.ge.s32.totalorder %s30_s30, 4   ;;  %s2000_s25 = smov %s1557_s26 }
 0x329   : > { %s2001_s26 = smov %s1561_s27  ;;  %s2002_s27 = smov %s1708_s21 }
 0x32a   : > { %s2003_s28 = smov %s1569_s29  ;;  %29 = sbr.rel (!%p27_p4) target bundleno = 13 (0xd), region = 137 }
 0x32d   : > { %s2004_s29 = smov %s1999_s16 }
 0x32f   :  { %1166 = vsyncpa [#allocation3], 1 }
 0x330   :  { %1168 = vsyncpa [#allocation3 + $0x1], 1 }
 0x331   :  { %1169 = vsyncpa [#allocation5], 1 }
 0x332   :  { %1171 = vsyncpa [#allocation5 + $0x1], 1 }

</bundles_post_ra>
